<compile_context>
chip_gen: v7x
topology: tpu7x:2x2x1
jax: 0.10.0
libtpu: 0.0.40
codegen_flags: <defaults>
</compile_context>

<pallas_src>
import functools

import jax
import jax.numpy as jnp
from jax.experimental import pallas as pl
from jax.experimental.pallas import tpu as pltpu

_MIB = 1024 * 1024


def _round_up(a: int, b: int) -> int:
    return (a + b - 1) // b * b


def _vmem_capacity_bytes() -> int:
    try:
        return int(pltpu.get_tpu_info().vmem_capacity_bytes)
    except Exception:
        return 64 * _MIB  # conservative (v7x-sized) fallback


def _is_v5e() -> bool:
    try:
        kind = jax.devices()[0].device_kind.lower()
        return ("v5e" in kind) or ("v5 lite" in kind) or ("v5lite" in kind)
    except Exception:
        return False


def _pad2d(a, rows_to, cols_to):
    r, c = a.shape
    if r == rows_to and c == cols_to:
        return a
    return jnp.pad(a, ((0, rows_to - r), (0, cols_to - c)))


# ---------------------------------------------------------------------------
# Kernels
# ---------------------------------------------------------------------------

def _reglu_resident_kernel(x_ref, w1_ref, b1_ref, wv_ref, bv_ref, w2_ref,
                           b2_ref, o_ref):
    # Weights fully resident in VMEM (constant index_maps); one row tile per
    # grid step, output written directly (no accumulator RMW).
    x = x_ref[...]
    g = jnp.dot(x, w1_ref[...], preferred_element_type=jnp.float32) + b1_ref[...]
    g = jnp.maximum(g, 0.0)
    v = jnp.dot(x, wv_ref[...], preferred_element_type=jnp.float32) + bv_ref[...]
    # TODO(synk): dropout is identity (inference); training-mode dropout would
    # need pltpu.prng_seed + pltpu.prng_random_bits masking of h here.
    h = (g * v).astype(x.dtype)
    o_ref[...] = (jnp.dot(h, w2_ref[...], preferred_element_type=jnp.float32)
                  + b2_ref[...]).astype(o_ref.dtype)


def _reglu_tiled_kernel(x_ref, w1_ref, b1_ref, wv_ref, bv_ref, w2_ref, b2_ref,
                        o_ref, acc_ref, *, bf):
    # x_ref : (bm, dmp)        input row tile (caller dtype)
    # w1_ref: (dmp, bf)        W1 chunk over d_ff
    # b1_ref: (1, dfp)  f32    full bias, resident; sliced per chunk
    # wv_ref: (dmp, bf)        Wv chunk
    # bv_ref: (1, dfp)  f32    full bias, resident
    # w2_ref: (bf, dmp)        W2 chunk
    # b2_ref: (1, dmp)  f32    output bias, resident
    # o_ref : (bm, dmp)        output tile (caller dtype)
    # acc_ref: (bm, dmp) f32   accumulator over the d_ff axis
    ff = pl.program_id(1)

    @pl.when(ff == 0)
    def _():
        acc_ref[...] = jnp.zeros_like(acc_ref)

    off = pl.multiple_of(ff * bf, 128)
    x = x_ref[...]
    g = jnp.dot(x, w1_ref[...], preferred_element_type=jnp.float32)
    g = jnp.maximum(g + b1_ref[:, pl.ds(off, bf)], 0.0)
    v = jnp.dot(x, wv_ref[...], preferred_element_type=jnp.float32)
    v = v + bv_ref[:, pl.ds(off, bf)]
    # TODO(synk): dropout is identity (inference).
    h = (g * v).astype(x.dtype)
    acc_ref[...] += jnp.dot(h, w2_ref[...], preferred_element_type=jnp.float32)

    @pl.when(ff == pl.num_programs(1) - 1)
    def _():
        o_ref[...] = (acc_ref[...] + b2_ref[...]).astype(o_ref.dtype)


# ---------------------------------------------------------------------------
# VMEM budgeting helpers
# ---------------------------------------------------------------------------

def _resident_vmem_bytes(bm, dmp, dfp, itemsize):
    weights = 2 * 3 * dmp * dfp * itemsize          # conservatively x2 buffers
    biases = (2 * dfp + dmp) * 4
    io = 2 * 2 * bm * dmp * itemsize                # x + out, double-buffered
    inter = bm * dfp * (4 + 4 + itemsize)           # g, v (f32) + h (x dtype)
    return weights + biases + io + inter


def _tiled_vmem_bytes(bm, bf, dmp, dfp, itemsize, wbufs):
    io = 2 * 2 * bm * dmp * itemsize                # x + out, double-buffered
    w = wbufs * 3 * dmp * bf * itemsize             # W1/Wv/W2 chunks
    acc = bm * dmp * 4
    biases = (2 * dfp + dmp) * 4
    inter = bm * bf * (4 + 4 + itemsize)            # g, v (f32) + h (x dtype)
    return io + w + acc + biases + inter


def _pick_resident_bm(m, bm_hint, dmp, dfp, itemsize, sub, budget):
    bm = min(_round_up(bm_hint, sub), _round_up(m, sub))
    while True:
        if _resident_vmem_bytes(bm, dmp, dfp, itemsize) <= budget:
            return bm
        if bm <= max(sub, 128):
            return None
        bm = max(sub, _round_up(bm // 2, sub))


# ---------------------------------------------------------------------------
# Wrapper
# ---------------------------------------------------------------------------

def reglu(x, w1, b1, wv, bv, w2, b2, *, block_m=None, block_ff=None):
    """Fused gated FFN.  x: (..., d_model); w1, wv: (d_model, d_ff);
    b1, bv: (d_ff,); w2: (d_ff, d_model); b2: (d_model,)."""
    d_model = x.shape[-1]
    d_ff = w1.shape[-1]
    lead = x.shape[:-1]
    out_dtype = x.dtype

    x2 = x.reshape(-1, d_model)
    m = x2.shape[0]

    # Lane-dense padding targets for the feature dims.
    dmp = _round_up(d_model, 128)
    dfp = _round_up(d_ff, 128)

    itemsize = jnp.dtype(x2.dtype).itemsize
    sub = 8 if itemsize >= 4 else (16 if itemsize == 2 else 32)

    # --- generation-aware sizing ------------------------------------------
    vmem_cap = _vmem_capacity_bytes()
    v5e = _is_v5e()
    if block_m is None:
        block_m = 512 if v5e else 1024
    if block_ff is None:
        block_ff = 512 if v5e else 1024

    vmem_limit = min(int(vmem_cap * 0.75), 100 * _MIB)
    budget = int(vmem_limit * 0.85)

    # Small-VMEM parts (v7x-like) have 2 TensorCores: keep >= 2 row tiles so
    # the "parallel" M axis shards across both cores.
    if (not v5e) and vmem_cap <= 96 * _MIB and m > 256:
        block_m = min(block_m, max(256, _round_up(pl.cdiv(m, 2), 256)))

    bm = min(_round_up(block_m, sub), _round_up(m, sub))

    # --- padding (guarded: no-op for 128-aligned dims) ----------------------
    f32 = jnp.float32
    x2p = _pad2d(x2, m, dmp)
    w1p = _pad2d(w1, dmp, dfp)
    wvp = _pad2d(wv, dmp, dfp)
    w2p = _pad2d(w2, dfp, dmp)
    b1p = _pad2d(b1.astype(f32).reshape(1, d_ff), 1, dfp)
    bvp = _pad2d(bv.astype(f32).reshape(1, d_ff), 1, dfp)
    b2p = _pad2d(b2.astype(f32).reshape(1, d_model), 1, dmp)

    # --- weight-resident fast path (128-MiB-VMEM parts) ---------------------
    if vmem_cap >= 96 * _MIB:
        bm_res = _pick_resident_bm(m, block_m, dmp, dfp, itemsize, sub, budget)
    else:
        bm_res = None

    if bm_res is not None:
        bm = bm_res
        grid_m = pl.cdiv(m, bm)
        out = pl.pallas_call(
            _reglu_resident_kernel,
            out_shape=jax.ShapeDtypeStruct((m, dmp), out_dtype),
            grid_spec=pltpu.PrefetchScalarGridSpec(
                num_scalar_prefetch=0,
                grid=(grid_m,),
                in_specs=[
                    pl.BlockSpec((bm, dmp), lambda i: (i, 0)),    # x row tile
                    pl.BlockSpec((dmp, dfp), lambda i: (0, 0)),   # W1 (resident)
                    pl.BlockSpec((1, dfp), lambda i: (0, 0)),     # b1
                    pl.BlockSpec((dmp, dfp), lambda i: (0, 0)),   # Wv (resident)
                    pl.BlockSpec((1, dfp), lambda i: (0, 0)),     # bv
                    pl.BlockSpec((dfp, dmp), lambda i: (0, 0)),   # W2 (resident)
                    pl.BlockSpec((1, dmp), lambda i: (0, 0)),     # b2
                ],
                out_specs=pl.BlockSpec((bm, dmp), lambda i: (i, 0)),
            ),
            compiler_params=pltpu.CompilerParams(
                dimension_semantics=("parallel",),
                vmem_limit_bytes=vmem_limit,
            ),
        )(x2p, w1p, b1p, wvp, bvp, w2p, b2p)
        return out[:, :d_model].reshape(*lead, d_model)

    # --- tiled d_ff path (small-VMEM parts / very large weights) ------------
    bf = min(_round_up(block_ff, 128), dfp)
    while _tiled_vmem_bytes(bm, bf, dmp, dfp, itemsize, 2) > budget:
        if bf > 128:
            bf = max(128, _round_up(bf // 2, 128))
        elif bm > max(sub, 256):
            bm = min(_round_up(m, sub), max(sub, _round_up(bm // 2, sub)))
        else:
            break

    grid_m = pl.cdiv(m, bm)
    grid_ff = pl.cdiv(dfp, bf)

    # Decode regime (single small row tile, many weight chunks): deepen the
    # weight pipeline to hide exposed HBM latency.
    deep_w = (grid_m == 1 and grid_ff >= 3 and
              _tiled_vmem_bytes(bm, bf, dmp, dfp, itemsize, 3) <= budget)
    wkw = dict(pipeline_mode=pl.Buffered(3)) if deep_w else {}

    kernel = functools.partial(_reglu_tiled_kernel, bf=bf)

    out = pl.pallas_call(
        kernel,
        out_shape=jax.ShapeDtypeStruct((m, dmp), out_dtype),
        grid_spec=pltpu.PrefetchScalarGridSpec(
            num_scalar_prefetch=0,
            grid=(grid_m, grid_ff),   # row tiles: parallel; d_ff: last/arbitrary
            in_specs=[
                pl.BlockSpec((bm, dmp), lambda i, f: (i, 0)),          # x row tile
                pl.BlockSpec((dmp, bf), lambda i, f: (0, f), **wkw),   # W1 chunk
                pl.BlockSpec((1, dfp), lambda i, f: (0, 0)),           # b1 (resident)
                pl.BlockSpec((dmp, bf), lambda i, f: (0, f), **wkw),   # Wv chunk
                pl.BlockSpec((1, dfp), lambda i, f: (0, 0)),           # bv (resident)
                pl.BlockSpec((bf, dmp), lambda i, f: (f, 0), **wkw),   # W2 chunk
                pl.BlockSpec((1, dmp), lambda i, f: (0, 0)),           # b2 (resident)
            ],
            out_specs=pl.BlockSpec((bm, dmp), lambda i, f: (i, 0)),
            scratch_shapes=[pltpu.VMEM((bm, dmp), jnp.float32)],
        ),
        compiler_params=pltpu.CompilerParams(
            dimension_semantics=("parallel", "arbitrary"),
            vmem_limit_bytes=vmem_limit,
        ),
    )(x2p, w1p, b1p, wvp, bvp, w2p, b2p)

    return out[:, :d_model].reshape(*lead, d_model)


# ---------------------------------------------------------------------------
# Demo / self-test
# ---------------------------------------------------------------------------

if __name__ == "__main__":
    # Small shapes consistent with the module: d_model=32, d_ff=64, batch=2, seq=8.
    d_model, d_ff = 32, 64
    batch, seq = 2, 8

    key = jax.random.PRNGKey(0)
    kx, k1, kb1, kv, kbv, k2, kb2 = jax.random.split(key, 7)

    x = jax.random.normal(kx, (batch, seq, d_model), dtype=jnp.float32)
    # nn.Linear(d_model, d_ff) stores weight (d_ff, d_model); we keep the
    # transposed (in, out) layout so the kernel computes x @ W + b.
    w1 = jax.random.normal(k1, (d_model, d_ff), jnp.float32) * (d_model ** -0.5)
    b1 = jax.random.normal(kb1, (d_ff,), jnp.float32) * 0.1
    wv = jax.random.normal(kv, (d_model, d_ff), jnp.float32) * (d_model ** -0.5)
    bv = jax.random.normal(kbv, (d_ff,), jnp.float32) * 0.1
    w2 = jax.random.normal(k2, (d_ff, d_model), jnp.float32) * (d_ff ** -0.5)
    b2 = jax.random.normal(kb2, (d_model,), jnp.float32) * 0.1

    # --- primary run: bf16 operands, f32 MXU accumulation (perf path) ---
    bf16 = jnp.bfloat16
    out_bf16 = reglu(x.astype(bf16), w1.astype(bf16), b1,
                     wv.astype(bf16), bv, w2.astype(bf16), b2)
    out_bf16 = jax.block_until_ready(out_bf16)

    # Reference emulating the kernel's precision path (bf16 operands, f32
    # accumulation, bf16 cast of h, bf16 output).
    xf, w1f = x.astype(bf16).astype(jnp.float32), w1.astype(bf16).astype(jnp.float32)
    wvf, w2f = wv.astype(bf16).astype(jnp.float32), w2.astype(bf16).astype(jnp.float32)
    g = jnp.maximum(xf @ w1f + b1, 0.0)
    v = xf @ wvf + bv
    h = (g * v).astype(bf16).astype(jnp.float32)
    ref_bf16 = (h @ w2f + b2).astype(bf16)

    assert out_bf16.shape == (batch, seq, d_model)
    assert jnp.allclose(out_bf16.astype(jnp.float32),
                        ref_bf16.astype(jnp.float32), atol=3e-2, rtol=3e-2)

    # --- secondary run: f32 end-to-end, tight numerical check ---
    out_f32 = jax.block_until_ready(reglu(x, w1, b1, wv, bv, w2, b2))
    ref_f32 = (jnp.maximum(x @ w1 + b1, 0.0) * (x @ wv + bv)) @ w2 + b2
    assert jnp.allclose(out_f32, ref_f32, atol=2e-4, rtol=2e-4)

    print("KERNEL_OK")
</pallas_src>

<mosaic_0001>
module attributes {stable_mosaic.version = 11 : i64} {
  func.func @_reglu_tiled_kernel(%arg0: i32, %arg1: i32, %arg2: memref<16x128xbf16, #tpu.memory_space<vmem>>, %arg3: memref<128x128xbf16, #tpu.memory_space<vmem>>, %arg4: memref<1x128xf32, #tpu.memory_space<vmem>>, %arg5: memref<128x128xbf16, #tpu.memory_space<vmem>>, %arg6: memref<1x128xf32, #tpu.memory_space<vmem>>, %arg7: memref<128x128xbf16, #tpu.memory_space<vmem>>, %arg8: memref<1x128xf32, #tpu.memory_space<vmem>>, %arg9: memref<16x128xbf16, #tpu.memory_space<vmem>>, %arg10: memref<16x128xf32, #tpu.memory_space<vmem>>) attributes {dimension_semantics = [#tpu.dimension_semantics<parallel>, #tpu.dimension_semantics<arbitrary>], iteration_bounds = array<i64: 1, 1>, scalar_prefetch = 0 : i64, scratch_operands = 1 : i64, tpu.core_type = #tpu.core_type<tc>, window_params = [{transform_indices = @transform_0, window_bounds = array<i64: 16, 128>}, {transform_indices = @transform_1, window_bounds = array<i64: 128, 128>}, {pipeline_mode = #tpu.pipeline_mode<synchronous>, transform_indices = @transform_2, window_bounds = array<i64: 1, 128>}, {transform_indices = @transform_3, window_bounds = array<i64: 128, 128>}, {pipeline_mode = #tpu.pipeline_mode<synchronous>, transform_indices = @transform_4, window_bounds = array<i64: 1, 128>}, {transform_indices = @transform_5, window_bounds = array<i64: 128, 128>}, {pipeline_mode = #tpu.pipeline_mode<synchronous>, transform_indices = @transform_6, window_bounds = array<i64: 1, 128>}, {transform_indices = @transform_7, window_bounds = array<i64: 16, 128>}]} {
    %c0_i32 = arith.constant 0 : i32
    %0 = arith.cmpi eq, %arg1, %c0_i32 : i32
    %1 = arith.extui %0 : i1 to i32
    %c0_i32_0 = arith.constant 0 : i32
    %2 = arith.cmpi ne, %1, %c0_i32_0 : i32
    scf.if %2 {
      %cst_19 = arith.constant 0.000000e+00 : f32
      %30 = vector.broadcast %cst_19 : f32 to vector<16x128xf32>
      %c0_20 = arith.constant 0 : index
      %c0_21 = arith.constant 0 : index
      %31 = vector.load %arg10[%c0_20, %c0_21] : memref<16x128xf32, #tpu.memory_space<vmem>>, vector<16x128xf32>
      tpu.vector_store %arg10[%c0_20, %c0_21], %30 {strides = array<i32>} : memref<16x128xf32, #tpu.memory_space<vmem>>, vector<16x128xf32>,
    } else {
    }
    %c128_i32 = arith.constant 128 : i32
    %3 = arith.muli %arg1, %c128_i32 : i32
    %4 = tpu.assume_multiple %3, 128 : i32
    %c0 = arith.constant 0 : index
    %c0_1 = arith.constant 0 : index
    %5 = vector.load %arg2[%c0, %c0_1] : memref<16x128xbf16, #tpu.memory_space<vmem>>, vector<16x128xbf16>
    %c0_2 = arith.constant 0 : index
    %c0_3 = arith.constant 0 : index
    %6 = vector.load %arg3[%c0_2, %c0_3] : memref<128x128xbf16, #tpu.memory_space<vmem>>, vector<128x128xbf16>
    %cst = arith.constant dense<0.000000e+00> : vector<16x128xf32>
    %7 = tpu.matmul %5, %6, %cst {dimension_numbers = #tpu.dot_dimension_numbers<[1], [0], [0], [1], [0, 0, 1, 1], [], []>} : vector<16x128xbf16>, vector<128x128xbf16>, vector<16x128xf32> -> vector<16x128xf32>
    %c0_4 = arith.constant 0 : index
    %8 = arith.index_cast %4 : i32 to index
    %9 = vector.load %arg4[%c0_4, %8] : memref<1x128xf32, #tpu.memory_space<vmem>>, vector<1x128xf32>
    %10 = vector.broadcast %9 : vector<1x128xf32> to vector<16x128xf32>
    %11 = arith.addf %7, %10 : vector<16x128xf32>
    %cst_5 = arith.constant 0.000000e+00 : f32
    %12 = vector.broadcast %cst_5 : f32 to vector<16x128xf32>
    %13 = arith.maximumf %11, %12 : vector<16x128xf32>
    %c0_6 = arith.constant 0 : index
    %c0_7 = arith.constant 0 : index
    %14 = vector.load %arg5[%c0_6, %c0_7] : memref<128x128xbf16, #tpu.memory_space<vmem>>, vector<128x128xbf16>
    %cst_8 = arith.constant dense<0.000000e+00> : vector<16x128xf32>
    %15 = tpu.matmul %5, %14, %cst_8 {dimension_numbers = #tpu.dot_dimension_numbers<[1], [0], [0], [1], [0, 0, 1, 1], [], []>} : vector<16x128xbf16>, vector<128x128xbf16>, vector<16x128xf32> -> vector<16x128xf32>
    %c0_9 = arith.constant 0 : index
    %16 = arith.index_cast %4 : i32 to index
    %17 = vector.load %arg6[%c0_9, %16] : memref<1x128xf32, #tpu.memory_space<vmem>>, vector<1x128xf32>
    %18 = vector.broadcast %17 : vector<1x128xf32> to vector<16x128xf32>
    %19 = arith.addf %15, %18 : vector<16x128xf32>
    %20 = arith.mulf %13, %19 : vector<16x128xf32>
    %21 = arith.truncf %20 : vector<16x128xf32> to vector<16x128xbf16>
    %c0_10 = arith.constant 0 : index
    %c0_11 = arith.constant 0 : index
    %22 = vector.load %arg10[%c0_10, %c0_11] : memref<16x128xf32, #tpu.memory_space<vmem>>, vector<16x128xf32>
    %c0_12 = arith.constant 0 : index
    %c0_13 = arith.constant 0 : index
    %23 = vector.load %arg7[%c0_12, %c0_13] : memref<128x128xbf16, #tpu.memory_space<vmem>>, vector<128x128xbf16>
    %cst_14 = arith.constant dense<0.000000e+00> : vector<16x128xf32>
    %24 = tpu.matmul %21, %23, %cst_14 {dimension_numbers = #tpu.dot_dimension_numbers<[1], [0], [0], [1], [0, 0, 1, 1], [], []>} : vector<16x128xbf16>, vector<128x128xbf16>, vector<16x128xf32> -> vector<16x128xf32>
    %25 = arith.addf %22, %24 : vector<16x128xf32>
    %c0_15 = arith.constant 0 : index
    %c0_16 = arith.constant 0 : index
    %26 = vector.load %arg10[%c0_15, %c0_16] : memref<16x128xf32, #tpu.memory_space<vmem>>, vector<16x128xf32>
    tpu.vector_store %arg10[%c0_15, %c0_16], %25 {strides = array<i32>} : memref<16x128xf32, #tpu.memory_space<vmem>>, vector<16x128xf32>,
    %c0_i32_17 = arith.constant 0 : i32
    %27 = arith.cmpi eq, %arg1, %c0_i32_17 : i32
    %28 = arith.extui %27 : i1 to i32
    %c0_i32_18 = arith.constant 0 : i32
    %29 = arith.cmpi ne, %28, %c0_i32_18 : i32
    scf.if %29 {
      %c0_19 = arith.constant 0 : index
      %c0_20 = arith.constant 0 : index
      %30 = vector.load %arg10[%c0_19, %c0_20] : memref<16x128xf32, #tpu.memory_space<vmem>>, vector<16x128xf32>
      %c0_21 = arith.constant 0 : index
      %c0_22 = arith.constant 0 : index
      %31 = vector.load %arg8[%c0_21, %c0_22] : memref<1x128xf32, #tpu.memory_space<vmem>>, vector<1x128xf32>
      %32 = vector.broadcast %31 : vector<1x128xf32> to vector<16x128xf32>
      %33 = arith.addf %30, %32 : vector<16x128xf32>
      %34 = arith.truncf %33 : vector<16x128xf32> to vector<16x128xbf16>
      %c0_23 = arith.constant 0 : index
      %c0_24 = arith.constant 0 : index
      %35 = vector.load %arg9[%c0_23, %c0_24] : memref<16x128xbf16, #tpu.memory_space<vmem>>, vector<16x128xbf16>
      tpu.vector_store %arg9[%c0_23, %c0_24], %34 {strides = array<i32>} : memref<16x128xbf16, #tpu.memory_space<vmem>>, vector<16x128xbf16>,
    } else {
    }
    return
  }
  func.func @transform_0(%arg0: i32, %arg1: i32) -> (i32, i32) {
    %c0_i32 = arith.constant 0 : i32
    %c0_i32_0 = arith.constant 0 : i32
    return %arg0, %c0_i32 : i32, i32
  }
  func.func @transform_1(%arg0: i32, %arg1: i32) -> (i32, i32) {
    %c0_i32 = arith.constant 0 : i32
    %c0_i32_0 = arith.constant 0 : i32
    return %c0_i32, %arg1 : i32, i32
  }
  func.func @transform_2(%arg0: i32, %arg1: i32) -> (i32, i32) {
    %c0_i32 = arith.constant 0 : i32
    %c0_i32_0 = arith.constant 0 : i32
    %c0_i32_1 = arith.constant 0 : i32
    return %c0_i32, %c0_i32_0 : i32, i32
  }
  func.func @transform_3(%arg0: i32, %arg1: i32) -> (i32, i32) {
    %c0_i32 = arith.constant 0 : i32
    %c0_i32_0 = arith.constant 0 : i32
    return %c0_i32, %arg1 : i32, i32
  }
  func.func @transform_4(%arg0: i32, %arg1: i32) -> (i32, i32) {
    %c0_i32 = arith.constant 0 : i32
    %c0_i32_0 = arith.constant 0 : i32
    %c0_i32_1 = arith.constant 0 : i32
    return %c0_i32, %c0_i32_0 : i32, i32
  }
  func.func @transform_5(%arg0: i32, %arg1: i32) -> (i32, i32) {
    %c0_i32 = arith.constant 0 : i32
    %c0_i32_0 = arith.constant 0 : i32
    return %arg1, %c0_i32 : i32, i32
  }
  func.func @transform_6(%arg0: i32, %arg1: i32) -> (i32, i32) {
    %c0_i32 = arith.constant 0 : i32
    %c0_i32_0 = arith.constant 0 : i32
    %c0_i32_1 = arith.constant 0 : i32
    return %c0_i32, %c0_i32_0 : i32, i32
  }
  func.func @transform_7(%arg0: i32, %arg1: i32) -> (i32, i32) {
    %c0_i32 = arith.constant 0 : i32
    %c0_i32_0 = arith.constant 0 : i32
    return %arg0, %c0_i32 : i32, i32
  }
}

</mosaic_0001>

<bundles_post_ra>
// kernel: tpu_custom_call.1
= control target key start
LH: loop header
LB: loop body
LE: loop exit
PB: predicated region body
PF: predicated region fallthrough
CT: control target
= control target key end

     0   :  { %12 = vsyncpa [#allocation4], 0  ;;  %s940_s0 = inlined_call_operand.hbm [shape: bf16[16,128], index: 0, kind: input, shape index: {}]   ;;  %s941_s1 = inlined_call_operand.hbm [shape: bf16[128,128], index: 1, kind: input, shape index: {}]   ;;  %s942_s2 = inlined_call_operand.vmem [shape: f32[1,128], index: 2, kind: input, shape index: {}]   ;;  %s943_s3 = inlined_call_operand.hbm [shape: bf16[128,128], index: 3, kind: input, shape index: {}]   ;;  %s944_s4 = inlined_call_operand.vmem [shape: f32[1,128], index: 4, kind: input, shape index: {}]   ;;  %s945_s5 = inlined_call_operand.hbm [shape: bf16[128,128], index: 5, kind: input, shape index: {}]   ;;  %s946_s6 = inlined_call_operand.vmem [shape: f32[1,128], index: 6, kind: input, shape index: {}]   ;;  %s947_s7 = inlined_call_operand.hbm [shape: bf16[16,128], index: 7, kind: output, shape index: {}]  }
   0x1   :  { %13 = vsyncpa [#allocation7], 0 }
   0x2   :  { %14 = vsyncpa [#allocation10], 0 }
   0x3   :  { %15 = vsyncpa [#allocation5], 0  ;;  %s763_s24 = smov [#allocation6]   ;;  %s764_s26 = smov [#allocation3]  }
   0x4   :  { %s33_s25 = sshll.u32 %s763_s24, 4  ;;  %s21_s27 = sshll.u32 %s764_s26, 4  ;;  %s34_s25 = int_to_ptr.vmem [resolvable:$true] %s33_s25  ;;  %s812_s27 = int_to_ptr.vmem [resolvable:$true] %s21_s27 }
   0x5   :  { %s645_s30 = scalar_lea.hbm %s941_s1, 1024 }
   0x6   :  { %p646_p0 = scmp.ne.s32.totalorder %s941_s1, %s645_s30  ;;  %p649_p1 = scmp.lt.u32.totalorder %s645_s30, %s941_s1 }
   0x8   :  { %p651_p2 = pnand %p649_p1, %p646_p0 }
   0xa   :  { %654 = shalt.err (!%p651_p2)
}
   0xb   :  { %s655_s12 = scalar_lea.vmem %s34_s25, 1024  ;;  %p660_p4 = scmp.lt.s32.totalorder %s34_s25, %s34_s25 }
   0xc   :  { %p656_p3 = scmp.ne.s32.totalorder %s34_s25, %s655_s12  ;;  %p661_p5 = scmp.lt.s32.totalorder %s655_s12, %s655_s12 }
   0xe   :  { %p662_p6 = por %p661_p5, %p660_p4 }
  0x10   :  { %p663_p7 = pnand %p662_p6, %p656_p3 }
  0x12   :  { %666 = shalt.err (!%p663_p7)
}
  0x13   :  { %s765_s13 = smov 64   ;;  %s766_s14 = smov 4  }
  0x14   :  { %39 = dma.hbm_to_vmem [thread:$0]  %s941_s1, 1024, %s34_s25, [#allocation7], %s765_s13, %s765_s13, %s766_s14  }
  0x15   :  { %s667_s19 = scalar_lea.hbm %s940_s0, 128 }
  0x16   :  { %p668_p8 = scmp.ne.s32.totalorder %s940_s0, %s667_s19  ;;  %p671_p9 = scmp.lt.u32.totalorder %s667_s19, %s940_s0 }
  0x18   :  { %p673_p10 = pnand %p671_p9, %p668_p8 }
  0x1a   :  { %676 = shalt.err (!%p673_p10)
}
  0x1b   :  { %s677_s24 = scalar_lea.vmem %s812_s27, 128  ;;  %p682_p12 = scmp.lt.s32.totalorder %s812_s27, %s812_s27 }
  0x1c   :  { %p678_p11 = scmp.ne.s32.totalorder %s812_s27, %s677_s24  ;;  %p683_p13 = scmp.lt.s32.totalorder %s677_s24, %s677_s24 }
  0x1e   :  { %p684_p0 = por %p683_p13, %p682_p12 }
  0x20   :  { %p685_p1 = pnand %p684_p0, %p678_p11 }
  0x22   :  { %688 = shalt.err (!%p685_p1)
}
  0x23   :  { %27 = dma.hbm_to_vmem [thread:$0]  %s940_s0, 128, %s812_s27, [#allocation4], %s765_s13, %s765_s13, %s766_s14  }
  0x24   :  { %s767_s26 = smov [#allocation8]   ;;  %s768_s29 = smov [#allocation9]  }
  0x25   :  { %s47_s28 = sshll.u32 %s767_s26, 4  ;;  %s61_s30 = sshll.u32 %s768_s29, 4  ;;  %s48_s28 = int_to_ptr.vmem [resolvable:$true] %s47_s28  ;;  %s849_s30 = int_to_ptr.vmem [resolvable:$true] %s61_s30 }
  0x26   :  { %s689_s10 = scalar_lea.hbm %s943_s3, 1024 }
  0x27   :  { %p690_p2 = scmp.ne.s32.totalorder %s943_s3, %s689_s10  ;;  %p693_p3 = scmp.lt.u32.totalorder %s689_s10, %s943_s3 }
  0x29   :  { %p695_p4 = pnand %p693_p3, %p690_p2 }
  0x2b   :  { %698 = shalt.err (!%p695_p4)
}
  0x2c   :  { %s699_s0 = scalar_lea.vmem %s48_s28, 1024  ;;  %p704_p6 = scmp.lt.s32.totalorder %s48_s28, %s48_s28 }
  0x2d   :  { %p700_p5 = scmp.ne.s32.totalorder %s48_s28, %s699_s0  ;;  %p705_p7 = scmp.lt.s32.totalorder %s699_s0, %s699_s0 }
  0x2f   :  { %p706_p8 = por %p705_p7, %p704_p6 }
  0x31   :  { %p707_p9 = pnand %p706_p8, %p700_p5 }
  0x33   :  { %710 = shalt.err (!%p707_p9)
}
  0x34   :  { %53 = dma.hbm_to_vmem [thread:$0]  %s943_s3, 1024, %s48_s28, [#allocation7], %s765_s13, %s765_s13, %s766_s14  }
  0x35   :  { %s711_s20 = scalar_lea.hbm %s945_s5, 1024 }
  0x36   :  { %p712_p10 = scmp.ne.s32.totalorder %s945_s5, %s711_s20  ;;  %p715_p11 = scmp.lt.u32.totalorder %s711_s20, %s945_s5 }
  0x38   :  { %p717_p12 = pnand %p715_p11, %p712_p10 }
  0x3a   :  { %720 = shalt.err (!%p717_p12)
}
  0x3b   :  { %s721_s1 = scalar_lea.vmem %s849_s30, 1024  ;;  %p726_p0 = scmp.lt.s32.totalorder %s849_s30, %s849_s30 }
  0x3c   :  { %p722_p13 = scmp.ne.s32.totalorder %s849_s30, %s721_s1  ;;  %p727_p1 = scmp.lt.s32.totalorder %s721_s1, %s721_s1 }
  0x3e   :  { %p728_p2 = por %p727_p1, %p726_p0 }
  0x40   :  { %p729_p3 = pnand %p728_p2, %p722_p13 }
  0x42   :  { %732 = shalt.err (!%p729_p3)
}
  0x43   :  { %67 = dma.hbm_to_vmem [thread:$0]  %s945_s5, 1024, %s849_s30, [#allocation10], %s765_s13, %s765_s13, %s766_s14  }
  0x44   :  { %755 = dma.done.wait [#allocation4], 128  }
  0x45   :  { %756 = vsyncadd [#allocation4], 4294967168 }
  0x46   :  { %757 = dma.done.wait [#allocation7], 2048  }
  0x47   :  { %758 = vsyncadd [#allocation7], 4294965248 }
  0x48   :  { %759 = dma.done.wait [#allocation10], 1024  }
  0x49   :  { %760 = vsyncadd [#allocation10], 4294966272  ;;  %v769_v0 = vmov 0.0   ;;  %vm770_vm0 = vmmov 0   ;;  %v620_v1 = vld [vmem:[#allocation6] sm:$0xff]   ;;  %v622_v3 = vld [vmem:[#allocation6 + $0x8] sm:$0xff]  }
  0x4a   :  { %551 = vmatprep.subr.bf16.mxu0 %v769_v0  ;;  %571 = vmatprep.subr.bf16.mxu1 %v769_v0  ;;  %v621_v2 = vld [vmem:[#allocation8] sm:$0xff]   ;;  %v623_v4 = vld [vmem:[#allocation8 + $0x8] sm:$0xff]   ;;  %v624_v5 = vld [vmem:[#allocation6 + $0x10] sm:$0xff]   ;;  %s771_s30 = smov [#allocation11]  }
  0x4b   :  { %567 = vmatprep.mubr.msk.bf16.mxu0 %vm770_vm0, %v769_v0  ;;  %587 = vmatprep.mubr.msk.bf16.mxu1 %vm770_vm0, %v769_v0  ;;  %v625_v6 = vld [vmem:[#allocation8 + $0x10] sm:$0xff]   ;;  %v626_v7 = vld [vmem:[#allocation6 + $0x18] sm:$0xff]   ;;  %v628_v9 = vld [vmem:[#allocation6 + $0x20] sm:$0xff]   ;;  %s471_s8 = sshll.u32 %s771_s30, 4  ;;  %s472_s8 = int_to_ptr.vmem [resolvable:$true] %s471_s8 }
  0x4c   :  { %552 = vmatpush3.bf16.msra.mxu0 %v620_v1  ;;  %572 = vmatpush3.bf16.msra.mxu1 %v621_v2  ;;  %v627_v8 = vld [vmem:[#allocation8 + $0x18] sm:$0xff]   ;;  %v629_v10 = vld [vmem:[#allocation8 + $0x20] sm:$0xff]   ;;  %v630_v11 = vld [vmem:[#allocation6 + $0x28] sm:$0xff]   ;;  %s733_s9 = scalar_lea.vmem %s472_s8, 128  ;;  %p738_p5 = scmp.lt.s32.totalorder %s472_s8, %s472_s8 }
  0x4d   :  { %553 = vmatprep.subr.bf16.mxu0 %v769_v0  ;;  %573 = vmatprep.subr.bf16.mxu1 %v769_v0  ;;  %v631_v12 = vld [vmem:[#allocation8 + $0x28] sm:$0xff]   ;;  %v632_v13 = vld [vmem:[#allocation6 + $0x30] sm:$0xff]   ;;  %v634_v15 = vld [vmem:[#allocation6 + $0x38] sm:$0xff]   ;;  %p734_p4 = scmp.ne.s32.totalorder %s472_s8, %s733_s9  ;;  %p739_p6 = scmp.lt.s32.totalorder %s733_s9, %s733_s9 }
  0x4e   :  { %v633_v14 = vld [vmem:[#allocation8 + $0x30] sm:$0xff]   ;;  %v635_v16 = vld [vmem:[#allocation8 + $0x38] sm:$0xff]   ;;  %v637_v18 = vld [vmem:[#allocation9] sm:$0xff]  }
  0x4f   :  { %v636_v17 = vld [vmem:[#allocation3] sm:$0xff]   ;;  %v638_v19 = vld [vmem:[#allocation9 + $0x8] sm:$0xff]   ;;  %v639_v20 = vld [vmem:[#allocation9 + $0x10] sm:$0xff]   ;;  %p740_p7 = por %p739_p6, %p738_p5 }
  0x50   :  { %554 = vmatpush3.bf16.msra.mxu0 %v622_v3  ;;  %574 = vmatpush3.bf16.msra.mxu1 %v623_v4  ;;  %v640_v21 = vld [vmem:[#allocation9 + $0x18] sm:$0xff]   ;;  %v641_v22 = vld [vmem:[#allocation9 + $0x20] sm:$0xff]   ;;  %v642_v23 = vld [vmem:[#allocation9 + $0x28] sm:$0xff]  }
  0x51   :  { %555 = vmatprep.subr.bf16.mxu0 %v769_v0  ;;  %575 = vmatprep.subr.bf16.mxu1 %v769_v0  ;;  %v643_v24 = vld [vmem:[#allocation9 + $0x30] sm:$0xff]   ;;  %v644_v25 = vld [vmem:[#allocation9 + $0x38] sm:$0xff]   ;;  %p741_p8 = pnand %p740_p7, %p734_p4 }
  0x52   :  { %v487_v26 = vld [vmem:[%s942_s2] ss:$0 sm:$0xff] }
  0x53   :  { %v497_v27 = vld [vmem:[%s944_s4] ss:$0 sm:$0xff] }
  0x54   :  { %556 = vmatpush3.bf16.msra.mxu0 %v624_v5  ;;  %576 = vmatpush3.bf16.msra.mxu1 %v625_v6  ;;  %v514_v46 = vld [vmem:[%s946_s6] ss:$0 sm:$0xff] }
  0x55   :  { %557 = vmatprep.subr.bf16.mxu0 %v769_v0  ;;  %577 = vmatprep.subr.bf16.mxu1 %v769_v0 }
  0x58   :  { %558 = vmatpush3.bf16.msra.mxu0 %v626_v7  ;;  %578 = vmatpush3.bf16.msra.mxu1 %v627_v8 }
  0x59   :  { %559 = vmatprep.subr.bf16.mxu0 %v769_v0  ;;  %579 = vmatprep.subr.bf16.mxu1 %v769_v0 }
  0x5c   :  { %560 = vmatpush3.bf16.msra.mxu0 %v628_v9  ;;  %580 = vmatpush3.bf16.msra.mxu1 %v629_v10 }
  0x5d   :  { %561 = vmatprep.subr.bf16.mxu0 %v769_v0  ;;  %581 = vmatprep.subr.bf16.mxu1 %v769_v0 }
  0x60   :  { %562 = vmatpush3.bf16.msra.mxu0 %v630_v11  ;;  %582 = vmatpush3.bf16.msra.mxu1 %v631_v12 }
  0x61   :  { %563 = vmatprep.subr.bf16.mxu0 %v769_v0  ;;  %583 = vmatprep.subr.bf16.mxu1 %v769_v0 }
  0x64   :  { %564 = vmatpush3.bf16.msra.mxu0 %v632_v13  ;;  %584 = vmatpush3.bf16.msra.mxu1 %v633_v14 }
  0x65   :  { %565 = vmatprep.subr.bf16.mxu0 %v769_v0  ;;  %585 = vmatprep.subr.bf16.mxu1 %v769_v0 }
  0x68   :  { %566 = vmatpush3.bf16.msra.mxu0 %v634_v15  ;;  %586 = vmatpush3.bf16.msra.mxu1 %v635_v16 }
  0x69   :  { %591 = vmatprep.subr.bf16.mxu0 %v769_v0 }
  0x6b   :  { %568 = vmatmul.mubr.bf16.vlgmr.msra.gmra.mrb[0].mxu0 %v636_v17  ;;  %588 = vmatmul.mubr.bf16.vlgmr.msra.gmra.mrb[0].mxu1 %v636_v17 }
  0x6c   :  { %592 = vmatpush3.bf16.msra.mxu0 %v637_v18  ;;  %607 = vmatprep.mubr.msk.bf16.mxu0 %vm770_vm0, %v769_v0 }
  0x6d   :  { %593 = vmatprep.subr.bf16.mxu0 %v769_v0 }
  0x70   :  { %594 = vmatpush3.bf16.msra.mxu0 %v638_v19 }
  0x71   :  { %595 = vmatprep.subr.bf16.mxu0 %v769_v0 }
  0x74   :  { %596 = vmatpush3.bf16.msra.mxu0 %v639_v20 }
  0x75   :  { %597 = vmatprep.subr.bf16.mxu0 %v769_v0 }
  0x78   :  { %598 = vmatpush3.bf16.msra.mxu0 %v640_v21 }
  0x79   :  { %599 = vmatprep.subr.bf16.mxu0 %v769_v0 }
  0x7c   :  { %600 = vmatpush3.bf16.msra.mxu0 %v641_v22 }
  0x7d   :  { %601 = vmatprep.subr.bf16.mxu0 %v769_v0 }
  0x80   :  { %602 = vmatpush3.bf16.msra.mxu0 %v642_v23 }
  0x81   :  { %603 = vmatprep.subr.bf16.mxu0 %v769_v0 }
  0x84   :  { %604 = vmatpush3.bf16.msra.mxu0 %v643_v24 }
  0x85   :  { %605 = vmatprep.subr.bf16.mxu0 %v769_v0 }
  0x88   :  { %606 = vmatpush3.bf16.msra.mxu0 %v644_v25 }
 0x13e   :  { %v206_v28 = vpop.f32.mrb[0].mxu0  ;;  %v321_v30 = vpop.f32.mrb[0].mxu1 }
 0x13f   :  { %v207_v29 = vadd.f32 %v487_v26, %v206_v28  ;;  %v569_v31 = vpop.f32.mrb[1].mxu0  ;;  %v322_v32 = vadd.f32 %v497_v27, %v321_v30  ;;  %v589_v33 = vpop.f32.mrb[1].mxu1 }
 0x140   :  { %v209_v34 = vpop.f32.mrb[2].mxu0  ;;  %v324_v37 = vpop.f32.mrb[2].mxu1 }
 0x141   :  { %v213_v35 = vmax.f32 %v207_v29, 0.0  ;;  %v210_v36 = vadd.f32 %v487_v26, %v209_v34  ;;  %v570_v38 = vpop.f32.mrb[3].mxu0  ;;  %v590_v39 = vpop.f32.mrb[3].mxu1  ;;  %v325_v42 = vadd.f32 %v497_v27, %v324_v37 }
 0x143   :  { %v328_v40 = vmul.f32 %v322_v32, %v213_v35  ;;  %v214_v41 = vmax.f32 %v210_v36, 0.0 }
 0x145   :  { %v329_v43 = vmul.f32 %v325_v42, %v214_v41 }
 0x147   :  { %v330_v44 = vpack.c.bf16 %v329_v43, %v328_v40 }
 0x149   :  { %608 = vmatmul.mubr.bf16.vlgmr.msra.gmra.mrb[4].mxu0 %v330_v44 }
 0x21c   :  { %v431_v45 = vpop.f32.mrb[4].mxu0 }
 0x21d   :  { %v609_v47 = vpop.f32.mrb[5].mxu0  ;;  %v454_v49 = vadd.f32 %v514_v46, %v431_v45 }
 0x21e   :  { %v434_v48 = vpop.f32.mrb[6].mxu0 }
 0x21f   :  { %v455_v50 = vadd.f32 %v514_v46, %v434_v48  ;;  %v610_v51 = vpop.f32.mrb[7].mxu0 }
 0x221   :  { %v522_v52 = vpack.c.bf16 %v455_v50, %v454_v49 }
 0x223   :  { %523 = vst [vmem:[#allocation11] sm:$0xff] %v522_v52  }
 0x224   :  { %744 = shalt.err (!%p741_p8)
}
 0x225   :  { %s745_s6 = scalar_lea.hbm %s947_s7, 128 }
 0x226   :  { %p746_p9 = scmp.ne.s32.totalorder %s947_s7, %s745_s6  ;;  %p749_p10 = scmp.lt.u32.totalorder %s745_s6, %s947_s7 }
 0x228   :  { %p751_p11 = pnand %p749_p10, %p746_p9 }
 0x22a   :  { %754 = shalt.err (!%p751_p11)
}
 0x22b   :  { %477 = dma.vmem_to_hbm [thread:$0]  %s472_s8, 128, %s947_s7, [#allocation5], %s765_s13, %s765_s13, %s766_s14  }
 0x22c   :  { %761 = dma.done.wait [#allocation5], 128  }
 0x22d   :  { %762 = vsyncadd [#allocation5], 4294967168 }
 0x22e   :  { %481 = vsyncpa [#allocation4], 1 }
 0x22f   :  { %482 = vsyncpa [#allocation7], 1 }
 0x230   :  { %483 = vsyncpa [#allocation10], 1 }
 0x231   :  { %484 = vsyncpa [#allocation5], 1 }

</bundles_post_ra>
